<compile_context>
chip_gen: v7x
topology: tpu7x:2x2x1
jax: 0.10.0
libtpu: 0.0.40
codegen_flags: <defaults>
</compile_context>

<pallas_src>
import functools

import jax
import jax.numpy as jnp
from jax.experimental import pallas as pl
from jax.experimental.pallas import tpu as pltpu

_LANE = 128                         # vreg lane width
_SUBLANE = 8                        # vreg sublane count
_UNROLL_LIMIT = 8                   # unroll layers up to this count
_MAX_BLOCK_B = 2048                 # cap batch tile (amortizes ~0.35us/step)
_VMEM_TILE_BUDGET = 24 * 1024 * 1024   # budget used to size the batch tile
_VMEM_LIMIT_BYTES = 32 * 1024 * 1024   # < 64 MiB physical on v7x; raises v5e's 16 MiB default


def _round_up(x, m):
    return pl.cdiv(x, m) * m


def _choose_block_b(batch_pad, d_pad, itemsize):
    """Largest batch tile fitting the VMEM budget (double-buffered I/O + f32 temps)."""
    # 2x input tile + 2x output tile (double buffering) + ~3 f32 working copies.
    bytes_per_row = d_pad * (4 * itemsize + 3 * 4)
    tb = _VMEM_TILE_BUDGET // max(bytes_per_row, 1)
    tb = min(int(tb), _MAX_BLOCK_B, int(batch_pad))
    tb = max(_SUBLANE, (tb // _SUBLANE) * _SUBLANE)
    return tb


def _crossnet_kernel(x_ref, w_ref, b_ref, o_ref, *, layer_num):
    # x_ref : (TB, Dp)  input-feature tile
    # w_ref : (L,  Dp)  per-layer cross weights (originally (D, 1) each)
    # b_ref : (L,  Dp)  per-layer biases        (originally (D, 1) each)
    # o_ref : (TB, Dp)  output tile
    x0 = x_ref[...].astype(jnp.float32)
    xl = x0

    def layer(i, xl):
        w = w_ref[i, :].astype(jnp.float32)              # (Dp,)
        b = b_ref[i, :].astype(jnp.float32)              # (Dp,)
        # s_b = sum_d x_l[b, d] * w[d]  -> (TB, 1)   (XLU lane reduce, not MXU)
        s = jnp.sum(xl * w[None, :], axis=1, keepdims=True)
        # x_l = x_0 * s + bias + x_l
        return x0 * s + b[None, :] + xl

    if layer_num <= _UNROLL_LIMIT:
        for i in range(layer_num):                       # unrolled: small fixed L
            xl = layer(i, xl)
    else:
        xl = jax.lax.fori_loop(0, layer_num, layer, xl)  # bounds live ranges for big L

    o_ref[...] = xl.astype(o_ref.dtype)


@functools.partial(jax.jit, static_argnames=("block_b",))
def crossnet_forward(x, kernels, biases, *, block_b=None):
    """x: (B, D); kernels, biases: (L, D). Returns (B, D) in x.dtype.

    f32 and bf16 inputs both supported; compute is always f32 internally.
    """
    B, D = x.shape
    L = kernels.shape[0]
    dt = x.dtype

    d_pad = _round_up(D, _LANE)                          # lane-dense output
    b_pad8 = _round_up(B, _SUBLANE)
    tb = block_b if block_b is not None else _choose_block_b(
        b_pad8, d_pad, jnp.dtype(dt).itemsize)
    tb = max(_SUBLANE, (min(tb, b_pad8) // _SUBLANE) * _SUBLANE)
    b_pad = _round_up(B, tb)

    x_p = x
    if (b_pad, d_pad) != (B, D):
        x_p = jnp.pad(x, ((0, b_pad - B), (0, d_pad - D)))
    w_p = kernels if d_pad == D else jnp.pad(kernels, ((0, 0), (0, d_pad - D)))
    b_p = biases if d_pad == D else jnp.pad(biases, ((0, 0), (0, d_pad - D)))

    kernel_fn = functools.partial(_crossnet_kernel, layer_num=L)
    out = pl.pallas_call(
        kernel_fn,
        out_shape=jax.ShapeDtypeStruct((b_pad, d_pad), dt),
        grid_spec=pl.GridSpec(
            grid=(b_pad // tb,),
            in_specs=[
                pl.BlockSpec((tb, d_pad), lambda i: (i, 0)),   # x: batch-tiled
                pl.BlockSpec((L, d_pad), lambda i: (0, 0)),    # kernels: resident
                pl.BlockSpec((L, d_pad), lambda i: (0, 0)),    # biases: resident
            ],
            out_specs=pl.BlockSpec((tb, d_pad), lambda i: (i, 0)),
        ),
        input_output_aliases={0: 0},                           # out reuses padded x buffer
        compiler_params=pltpu.CompilerParams(
            dimension_semantics=("parallel",),                 # megacore-shard batch (v7x)
            vmem_limit_bytes=_VMEM_LIMIT_BYTES,
        ),
    )(x_p, w_p, b_p)

    if (b_pad, d_pad) != (B, D):
        out = out[:B, :D]
    return out


def crossnet_reference(x, kernels, biases):
    """Pure-JAX reference matching the PyTorch forward."""
    x0 = x[..., None]                                    # (B, D, 1)
    xl = x0
    for i in range(kernels.shape[0]):
        w = kernels[i][:, None]                          # (D, 1)
        b = biases[i][:, None]                           # (D, 1)
        xl_w = jnp.tensordot(xl, w, axes=([1], [0]))     # (B, 1, 1)
        dot_ = jnp.matmul(x0, xl_w)                      # (B, D, 1)
        xl = dot_ + b + xl
    return jnp.squeeze(xl, axis=2)


if __name__ == "__main__":
    key = jax.random.PRNGKey(0)

    # --- Primary small-shape check (matches the module defaults: layer_num=2) ---
    B, D, L = 8, 32, 2
    kx, kw = jax.random.split(key)
    x = jax.random.normal(kx, (B, D), dtype=jnp.float32)
    # xavier_normal_ for a (D, 1) weight: std = sqrt(2 / (D + 1))
    std = (2.0 / (D + 1)) ** 0.5
    kernels = jax.random.normal(kw, (L, D), dtype=jnp.float32) * std
    biases = jnp.zeros((L, D), dtype=jnp.float32)

    out = jax.block_until_ready(crossnet_forward(x, kernels, biases))
    ref = crossnet_reference(x, kernels, biases)
    assert out.shape == (B, D)
    assert jnp.allclose(out, ref, atol=1e-5, rtol=1e-5), "mismatch vs reference"

    # --- Tiling/padding check: non-aligned D, multiple batch tiles, batch pad ---
    B2, D2, L2 = 20, 40, 3
    k1, k2, k3 = jax.random.split(key, 3)
    x2 = jax.random.normal(k1, (B2, D2), dtype=jnp.float32)
    std2 = (2.0 / (D2 + 1)) ** 0.5
    kernels2 = jax.random.normal(k2, (L2, D2), dtype=jnp.float32) * std2
    biases2 = jax.random.normal(k3, (L2, D2), dtype=jnp.float32) * 0.01
    out2 = jax.block_until_ready(
        crossnet_forward(x2, kernels2, biases2, block_b=8))   # grid=(3,), padded B/D
    ref2 = crossnet_reference(x2, kernels2, biases2)
    assert out2.shape == (B2, D2)
    assert jnp.allclose(out2, ref2, atol=1e-5, rtol=1e-5), "mismatch vs reference (tiled)"

    print("KERNEL_OK")
</pallas_src>

<mosaic_0001>
module attributes {stable_mosaic.version = 11 : i64} {
  func.func @_crossnet_kernel(%arg0: i32, %arg1: memref<8x128xf32, #tpu.memory_space<vmem>>, %arg2: memref<2x128xf32, #tpu.memory_space<vmem>>, %arg3: memref<2x128xf32, #tpu.memory_space<vmem>>, %arg4: memref<8x128xf32, #tpu.memory_space<vmem>>) attributes {dimension_semantics = [#tpu.dimension_semantics<parallel>], iteration_bounds = array<i64: 1>, scalar_prefetch = 0 : i64, scratch_operands = 0 : i64, tpu.core_type = #tpu.core_type<tc>, window_params = [{transform_indices = @transform_0, window_bounds = array<i64: 8, 128>}, {pipeline_mode = #tpu.pipeline_mode<synchronous>, transform_indices = @transform_1, window_bounds = array<i64: 2, 128>}, {pipeline_mode = #tpu.pipeline_mode<synchronous>, transform_indices = @transform_2, window_bounds = array<i64: 2, 128>}, {transform_indices = @transform_3, window_bounds = array<i64: 8, 128>}]} {
    %c0 = arith.constant 0 : index
    %c0_0 = arith.constant 0 : index
    %0 = vector.load %arg1[%c0, %c0_0] : memref<8x128xf32, #tpu.memory_space<vmem>>, vector<8x128xf32>
    %c0_1 = arith.constant 0 : index
    %c0_2 = arith.constant 0 : index
    %1 = vector.load %arg2[%c0_1, %c0_2] : memref<2x128xf32, #tpu.memory_space<vmem>>, vector<1x128xf32>
    %2 = vector.shape_cast %1 : vector<1x128xf32> to vector<128xf32>
    %c0_3 = arith.constant 0 : index
    %c0_4 = arith.constant 0 : index
    %3 = vector.load %arg3[%c0_3, %c0_4] : memref<2x128xf32, #tpu.memory_space<vmem>>, vector<1x128xf32>
    %4 = vector.shape_cast %3 : vector<1x128xf32> to vector<128xf32>
    %5 = vector.shape_cast %2 : vector<128xf32> to vector<1x128xf32>
    %6 = vector.broadcast %5 : vector<1x128xf32> to vector<8x128xf32>
    %7 = arith.mulf %0, %6 : vector<8x128xf32>
    %cst = arith.constant dense<0.000000e+00> : vector<8xf32>
    %8 = vector.multi_reduction <add>, %7, %cst [1] : vector<8x128xf32> to vector<8xf32>
    %9 = vector.shape_cast %8 : vector<8xf32> to vector<8x1xf32>
    %10 = vector.broadcast %9 : vector<8x1xf32> to vector<8x128xf32>
    %11 = arith.mulf %0, %10 : vector<8x128xf32>
    %12 = vector.shape_cast %4 : vector<128xf32> to vector<1x128xf32>
    %13 = vector.broadcast %12 : vector<1x128xf32> to vector<8x128xf32>
    %14 = arith.addf %11, %13 : vector<8x128xf32>
    %15 = arith.addf %14, %0 : vector<8x128xf32>
    %c1 = arith.constant 1 : index
    %c0_5 = arith.constant 0 : index
    %16 = vector.load %arg2[%c1, %c0_5] : memref<2x128xf32, #tpu.memory_space<vmem>>, vector<1x128xf32>
    %17 = vector.shape_cast %16 : vector<1x128xf32> to vector<128xf32>
    %c1_6 = arith.constant 1 : index
    %c0_7 = arith.constant 0 : index
    %18 = vector.load %arg3[%c1_6, %c0_7] : memref<2x128xf32, #tpu.memory_space<vmem>>, vector<1x128xf32>
    %19 = vector.shape_cast %18 : vector<1x128xf32> to vector<128xf32>
    %20 = vector.shape_cast %17 : vector<128xf32> to vector<1x128xf32>
    %21 = vector.broadcast %20 : vector<1x128xf32> to vector<8x128xf32>
    %22 = arith.mulf %15, %21 : vector<8x128xf32>
    %cst_8 = arith.constant dense<0.000000e+00> : vector<8xf32>
    %23 = vector.multi_reduction <add>, %22, %cst_8 [1] : vector<8x128xf32> to vector<8xf32>
    %24 = vector.shape_cast %23 : vector<8xf32> to vector<8x1xf32>
    %25 = vector.broadcast %24 : vector<8x1xf32> to vector<8x128xf32>
    %26 = arith.mulf %0, %25 : vector<8x128xf32>
    %27 = vector.shape_cast %19 : vector<128xf32> to vector<1x128xf32>
    %28 = vector.broadcast %27 : vector<1x128xf32> to vector<8x128xf32>
    %29 = arith.addf %26, %28 : vector<8x128xf32>
    %30 = arith.addf %29, %15 : vector<8x128xf32>
    %c0_9 = arith.constant 0 : index
    %c0_10 = arith.constant 0 : index
    %31 = vector.load %arg4[%c0_9, %c0_10] : memref<8x128xf32, #tpu.memory_space<vmem>>, vector<8x128xf32>
    tpu.vector_store %arg4[%c0_9, %c0_10], %30 {strides = array<i32>} : memref<8x128xf32, #tpu.memory_space<vmem>>, vector<8x128xf32>,
    return
  }
  func.func @transform_0(%arg0: i32) -> (i32, i32) {
    %c0_i32 = arith.constant 0 : i32
    %c0_i32_0 = arith.constant 0 : i32
    return %arg0, %c0_i32 : i32, i32
  }
  func.func @transform_1(%arg0: i32) -> (i32, i32) {
    %c0_i32 = arith.constant 0 : i32
    %c0_i32_0 = arith.constant 0 : i32
    %c0_i32_1 = arith.constant 0 : i32
    return %c0_i32, %c0_i32_0 : i32, i32
  }
  func.func @transform_2(%arg0: i32) -> (i32, i32) {
    %c0_i32 = arith.constant 0 : i32
    %c0_i32_0 = arith.constant 0 : i32
    %c0_i32_1 = arith.constant 0 : i32
    return %c0_i32, %c0_i32_0 : i32, i32
  }
  func.func @transform_3(%arg0: i32) -> (i32, i32) {
    %c0_i32 = arith.constant 0 : i32
    %c0_i32_0 = arith.constant 0 : i32
    return %arg0, %c0_i32 : i32, i32
  }
}

</mosaic_0001>

<bundles_post_ra>
// kernel: crossnet_forward.1
= control target key start
LH: loop header
LB: loop body
LE: loop exit
PB: predicated region body
PF: predicated region fallthrough
CT: control target
= control target key end

     0   :  { %s94_s0 = inlined_call_operand.vmem [shape: f32[8,128], index: 0, kind: input, shape index: {}, may-alias: {0,3}]   ;;  %s95_s1 = inlined_call_operand.vmem [shape: f32[2,128], index: 1, kind: input, shape index: {}]   ;;  %s96_s2 = inlined_call_operand.vmem [shape: f32[2,128], index: 2, kind: input, shape index: {}]   ;;  %s97_s3 = inlined_call_operand.vmem [shape: f32[8,128], index: 3, kind: output, shape index: {}, may-alias: {0,3}]  }
   0x1   :  { %v14_v0 = vld [vmem:[%s94_s0] sm:$0xff] }
   0x2   :  { %v52_v1 = vld [vmem:[%s95_s1] ss:$0 sm:$0xff]  ;;  %v54_v7 = vld [vmem:[%s95_s1 + $0x1] ss:$0 sm:$0xff] }
   0x3   :  { %v21_v2 = vmul.f32 %v52_v1, %v14_v0  ;;  %v53_v3 = vld [vmem:[%s96_s2] ss:$0 sm:$0xff]  ;;  %v55_v10 = vld [vmem:[%s96_s2 + $0x1] ss:$0 sm:$0xff] }
   0x5   :  { %22 = vadd.xlane.f32.xlu0 %v21_v2 }
  0x92   :  { %v23_v4 = vpop.xlane.xlu0 %22 }
  0x93   :  { %v24_v5 = vmul.f32 %v23_v4, %v14_v0 }
  0x95   :  { %v29_v6 = vadd.f32 %v53_v3, %v24_v5 }
  0x97   :  { %v30_v8 = vadd.f32 %v29_v6, %v14_v0 }
  0x99   :  { %v37_v9 = vmul.f32 %v54_v7, %v30_v8 }
  0x9b   :  { %38 = vadd.xlane.f32.xlu0 %v37_v9 }
 0x128   :  { %v39_v11 = vpop.xlane.xlu0 %38 }
 0x129   :  { %v40_v12 = vmul.f32 %v39_v11, %v14_v0 }
 0x12b   :  { %v45_v13 = vadd.f32 %v55_v10, %v40_v12 }
 0x12d   :  { %v46_v14 = vadd.f32 %v45_v13, %v30_v8 }
 0x12f   :  { %47 = vst [vmem:[%s97_s3] sm:$0xff] %v46_v14 }

</bundles_post_ra>
